<compile_context>
chip_gen: v6e
topology: v6e:2x2x1
jax: 0.10.0
libtpu: 0.0.40
codegen_flags: <defaults>
</compile_context>

<pallas_src>
import functools

import jax
import jax.numpy as jnp
from jax.experimental import pallas as pl
from jax.experimental.pallas import tpu as pltpu


def _self_attention_kernel(num_heads, d_k, scale, tq,
                           x_ref,
                           wq_ref, bq_ref, wk_ref, bk_ref,
                           wv_ref, bv_ref, wo_ref, bo_ref,
                           o_ref):
    # Full sequence for this batch element, resident in VMEM across query tiles.
    x_all = x_ref[0]                                    # (S, D) bf16

    # Query-row tile is a slice of the already-resident sequence block.
    qi = pl.program_id(1)
    row0 = pl.multiple_of(qi * tq, tq)
    xq = x_ref[0, pl.ds(row0, tq), :]                   # (TQ, D) bf16

    # Projections: y = x @ W + b   (bf16 MXU matmuls, f32 accumulation).
    q = jnp.dot(xq, wq_ref[...], preferred_element_type=jnp.float32) + bq_ref[...]
    k = jnp.dot(x_all, wk_ref[...], preferred_element_type=jnp.float32) + bk_ref[...]
    v = jnp.dot(x_all, wv_ref[...], preferred_element_type=jnp.float32) + bv_ref[...]

    # Fold the 1/sqrt(d_k) softmax scale into Q once (cheapest place: TQ x D).
    q = q * scale

    s = x_all.shape[0]

    # Head-major views: one relayout per tile instead of per-head lane slices.
    qh = jnp.transpose(q.reshape(tq, num_heads, d_k), (1, 0, 2)).astype(jnp.bfloat16)  # (H, TQ, dk)
    kh = jnp.transpose(k.reshape(s, num_heads, d_k), (1, 0, 2)).astype(jnp.bfloat16)   # (H, S,  dk)
    vh = jnp.transpose(v.reshape(s, num_heads, d_k), (1, 0, 2)).astype(jnp.bfloat16)   # (H, S,  dk)

    # energy[h, q, k] = <Q_hq, K_hk>: batched over heads, no explicit K.T.
    energy = jnp.einsum("hqd,hkd->hqk", qh, kh,
                        preferred_element_type=jnp.float32)          # (H, TQ, S) f32

    # Numerically stable softmax over the key axis.
    m = jnp.max(energy, axis=-1, keepdims=True)
    p = jnp.exp(energy - m)
    attn = p * pl.reciprocal(jnp.sum(p, axis=-1, keepdims=True), approx=True)

    # Context: attn @ V batched over heads; re-merge heads with one reshape.
    ctx = jnp.einsum("hqk,hkd->hqd", attn.astype(jnp.bfloat16), vh,
                     preferred_element_type=jnp.float32)             # (H, TQ, dk) f32
    merged = jnp.transpose(ctx, (1, 0, 2)).reshape(tq, num_heads * d_k)

    # Output projection.
    out = jnp.dot(merged.astype(jnp.bfloat16), wo_ref[...],
                  preferred_element_type=jnp.float32) + bo_ref[...]
    o_ref[0] = out.astype(o_ref.dtype)


def self_attention(x, params, num_heads):
    """x: (N, S, D); params: dict of (D, D) weights and (1, D) biases (f32)."""
    N, S, D = x.shape
    d_k = D // num_heads
    scale = 1.0 / float(d_k) ** 0.5

    # Query-row tile: 128 rows when S allows it, otherwise the whole sequence.
    TQ = 128 if (S % 128 == 0) else S
    n_qt = S // TQ

    # bf16 operands for the MXU (accumulation stays f32 inside the kernel).
    xb = x.astype(jnp.bfloat16)
    wq = params["wq"].astype(jnp.bfloat16)
    wk = params["wk"].astype(jnp.bfloat16)
    wv = params["wv"].astype(jnp.bfloat16)
    wo = params["wo"].astype(jnp.bfloat16)

    # x block is constant over the query-tile axis -> fetched once per batch.
    x_spec = pl.BlockSpec((1, S, D), lambda n, qi: (n, 0, 0))
    w_spec = pl.BlockSpec((D, D), lambda n, qi: (0, 0))
    b_spec = pl.BlockSpec((1, D), lambda n, qi: (0, 0))
    out_spec = pl.BlockSpec((1, TQ, D), lambda n, qi: (n, qi, 0))

    kernel = functools.partial(_self_attention_kernel, num_heads, d_k, scale, TQ)

    # TODO(synk): for large S, add a KV grid axis ("arbitrary") with an online
    # (flash) softmax instead of materializing the full (H, TQ, S) scores, and
    # cache the K/V projections in VMEM scratch so they are not recomputed per
    # query tile.
    return pl.pallas_call(
        kernel,
        out_shape=jax.ShapeDtypeStruct((N, S, D), x.dtype),
        grid_spec=pltpu.PrefetchScalarGridSpec(
            num_scalar_prefetch=0,
            grid=(N, n_qt),
            in_specs=[
                x_spec,
                w_spec, b_spec,   # query
                w_spec, b_spec,   # key
                w_spec, b_spec,   # value
                w_spec, b_spec,   # fc_out
            ],
            out_specs=out_spec,
        ),
        compiler_params=pltpu.CompilerParams(
            dimension_semantics=("parallel", "parallel")),
    )(xb,
      wq, params["bq"],
      wk, params["bk"],
      wv, params["bv"],
      wo, params["bo"])


def _reference(x, params, num_heads):
    """Plain-JAX f32 reference mirroring the PyTorch forward exactly."""
    N, S, D = x.shape
    d_k = D // num_heads
    q = x @ params["wq"] + params["bq"]
    k = x @ params["wk"] + params["bk"]
    v = x @ params["wv"] + params["bv"]
    q = q.reshape(N, S, num_heads, d_k)
    k = k.reshape(N, S, num_heads, d_k)
    v = v.reshape(N, S, num_heads, d_k)
    energy = jnp.einsum("nqhd,nkhd->nhqk", q, k)
    attn = jax.nn.softmax(energy / (d_k ** 0.5), axis=3)
    out = jnp.einsum("nhql,nlhd->nqhd", attn, v).reshape(N, S, D)
    return out @ params["wo"] + params["bo"]


if __name__ == "__main__":
    # Small shapes consistent with the module: batch=2, seq=8, d_model=32, heads=4.
    N, S, D, H = 2, 8, 32, 4

    key = jax.random.PRNGKey(0)
    keys = jax.random.split(key, 9)
    x = jax.random.normal(keys[0], (N, S, D), dtype=jnp.float32)

    def lin_init(kw, kb):
        # nn.Linear-shaped params stored as (in, out) / (1, out).
        w = jax.random.normal(kw, (D, D), dtype=jnp.float32) * 0.1
        b = jax.random.normal(kb, (1, D), dtype=jnp.float32) * 0.1
        return w, b

    wq, bq = lin_init(keys[1], keys[2])
    wk, bk = lin_init(keys[3], keys[4])
    wv, bv = lin_init(keys[5], keys[6])
    wo, bo = lin_init(keys[7], keys[8])
    params = dict(wq=wq, bq=bq, wk=wk, bk=bk, wv=wv, bv=bv, wo=wo, bo=bo)

    out = self_attention(x, params, H)
    out = jax.block_until_ready(out)

    ref = _reference(x, params, H)
    assert out.shape == (N, S, D)
    # bf16 matmuls + approx reciprocal vs f32 reference -> slightly looser tol.
    assert jnp.allclose(out, ref, atol=2e-2, rtol=2e-2), "mismatch vs reference"

    print("KERNEL_OK")
</pallas_src>

<mosaic_0001>
module attributes {stable_mosaic.version = 11 : i64} {
  func.func @_self_attention_kernel(%arg0: i32, %arg1: i32, %arg2: memref<1x8x32xbf16, #tpu.memory_space<vmem>>, %arg3: memref<32x32xbf16, #tpu.memory_space<vmem>>, %arg4: memref<1x32xf32, #tpu.memory_space<vmem>>, %arg5: memref<32x32xbf16, #tpu.memory_space<vmem>>, %arg6: memref<1x32xf32, #tpu.memory_space<vmem>>, %arg7: memref<32x32xbf16, #tpu.memory_space<vmem>>, %arg8: memref<1x32xf32, #tpu.memory_space<vmem>>, %arg9: memref<32x32xbf16, #tpu.memory_space<vmem>>, %arg10: memref<1x32xf32, #tpu.memory_space<vmem>>, %arg11: memref<1x8x32xf32, #tpu.memory_space<vmem>>) attributes {dimension_semantics = [#tpu.dimension_semantics<parallel>, #tpu.dimension_semantics<parallel>], iteration_bounds = array<i64: 2, 1>, scalar_prefetch = 0 : i64, scratch_operands = 0 : i64, tpu.core_type = #tpu.core_type<tc>, window_params = [{transform_indices = @transform_0, window_bounds = array<i64: 1, 8, 32>}, {pipeline_mode = #tpu.pipeline_mode<synchronous>, transform_indices = @transform_1, window_bounds = array<i64: 32, 32>}, {pipeline_mode = #tpu.pipeline_mode<synchronous>, transform_indices = @transform_2, window_bounds = array<i64: 1, 32>}, {pipeline_mode = #tpu.pipeline_mode<synchronous>, transform_indices = @transform_3, window_bounds = array<i64: 32, 32>}, {pipeline_mode = #tpu.pipeline_mode<synchronous>, transform_indices = @transform_4, window_bounds = array<i64: 1, 32>}, {pipeline_mode = #tpu.pipeline_mode<synchronous>, transform_indices = @transform_5, window_bounds = array<i64: 32, 32>}, {pipeline_mode = #tpu.pipeline_mode<synchronous>, transform_indices = @transform_6, window_bounds = array<i64: 1, 32>}, {pipeline_mode = #tpu.pipeline_mode<synchronous>, transform_indices = @transform_7, window_bounds = array<i64: 32, 32>}, {pipeline_mode = #tpu.pipeline_mode<synchronous>, transform_indices = @transform_8, window_bounds = array<i64: 1, 32>}, {transform_indices = @transform_9, window_bounds = array<i64: 1, 8, 32>}]} {
    %c0 = arith.constant 0 : index
    %c0_0 = arith.constant 0 : index
    %c0_1 = arith.constant 0 : index
    %0 = vector.load %arg2[%c0, %c0_0, %c0_1] : memref<1x8x32xbf16, #tpu.memory_space<vmem>>, vector<1x8x32xbf16>
    %1 = vector.shape_cast %0 : vector<1x8x32xbf16> to vector<8x32xbf16>
    %c8_i32 = arith.constant 8 : i32
    %2 = arith.muli %arg1, %c8_i32 : i32
    %3 = tpu.assume_multiple %2, 8 : i32
    %c0_2 = arith.constant 0 : index
    %4 = arith.index_cast %3 : i32 to index
    %c0_3 = arith.constant 0 : index
    %5 = vector.load %arg2[%c0_2, %4, %c0_3] : memref<1x8x32xbf16, #tpu.memory_space<vmem>>, vector<1x8x32xbf16>
    %6 = vector.shape_cast %5 : vector<1x8x32xbf16> to vector<8x32xbf16>
    %c0_4 = arith.constant 0 : index
    %c0_5 = arith.constant 0 : index
    %7 = vector.load %arg3[%c0_4, %c0_5] : memref<32x32xbf16, #tpu.memory_space<vmem>>, vector<32x32xbf16>
    %cst = arith.constant dense<0.000000e+00> : vector<8x32xf32>
    %8 = tpu.matmul %6, %7, %cst {dimension_numbers = #tpu.dot_dimension_numbers<[1], [0], [0], [1], [0, 0, 1, 1], [], []>} : vector<8x32xbf16>, vector<32x32xbf16>, vector<8x32xf32> -> vector<8x32xf32>
    %c0_6 = arith.constant 0 : index
    %c0_7 = arith.constant 0 : index
    %9 = vector.load %arg4[%c0_6, %c0_7] : memref<1x32xf32, #tpu.memory_space<vmem>>, vector<1x32xf32>
    %10 = vector.broadcast %9 : vector<1x32xf32> to vector<8x32xf32>
    %11 = arith.addf %8, %10 : vector<8x32xf32>
    %c0_8 = arith.constant 0 : index
    %c0_9 = arith.constant 0 : index
    %12 = vector.load %arg5[%c0_8, %c0_9] : memref<32x32xbf16, #tpu.memory_space<vmem>>, vector<32x32xbf16>
    %cst_10 = arith.constant dense<0.000000e+00> : vector<8x32xf32>
    %13 = tpu.matmul %1, %12, %cst_10 {dimension_numbers = #tpu.dot_dimension_numbers<[1], [0], [0], [1], [0, 0, 1, 1], [], []>} : vector<8x32xbf16>, vector<32x32xbf16>, vector<8x32xf32> -> vector<8x32xf32>
    %c0_11 = arith.constant 0 : index
    %c0_12 = arith.constant 0 : index
    %14 = vector.load %arg6[%c0_11, %c0_12] : memref<1x32xf32, #tpu.memory_space<vmem>>, vector<1x32xf32>
    %15 = vector.broadcast %14 : vector<1x32xf32> to vector<8x32xf32>
    %16 = arith.addf %13, %15 : vector<8x32xf32>
    %c0_13 = arith.constant 0 : index
    %c0_14 = arith.constant 0 : index
    %17 = vector.load %arg7[%c0_13, %c0_14] : memref<32x32xbf16, #tpu.memory_space<vmem>>, vector<32x32xbf16>
    %cst_15 = arith.constant dense<0.000000e+00> : vector<8x32xf32>
    %18 = tpu.matmul %1, %17, %cst_15 {dimension_numbers = #tpu.dot_dimension_numbers<[1], [0], [0], [1], [0, 0, 1, 1], [], []>} : vector<8x32xbf16>, vector<32x32xbf16>, vector<8x32xf32> -> vector<8x32xf32>
    %c0_16 = arith.constant 0 : index
    %c0_17 = arith.constant 0 : index
    %19 = vector.load %arg8[%c0_16, %c0_17] : memref<1x32xf32, #tpu.memory_space<vmem>>, vector<1x32xf32>
    %20 = vector.broadcast %19 : vector<1x32xf32> to vector<8x32xf32>
    %21 = arith.addf %18, %20 : vector<8x32xf32>
    %cst_18 = arith.constant 0.353553385 : f32
    %22 = vector.broadcast %cst_18 : f32 to vector<8x32xf32>
    %23 = arith.mulf %11, %22 : vector<8x32xf32>
    %24 = vector.shape_cast %23 : vector<8x32xf32> to vector<8x4x8xf32>
    %25 = tpu.transpose %24, [1, 0, 2] : vector<8x4x8xf32> -> vector<4x8x8xf32>
    %26 = arith.truncf %25 : vector<4x8x8xf32> to vector<4x8x8xbf16>
    %27 = vector.shape_cast %16 : vector<8x32xf32> to vector<8x4x8xf32>
    %28 = tpu.transpose %27, [1, 0, 2] : vector<8x4x8xf32> -> vector<4x8x8xf32>
    %29 = arith.truncf %28 : vector<4x8x8xf32> to vector<4x8x8xbf16>
    %30 = vector.shape_cast %21 : vector<8x32xf32> to vector<8x4x8xf32>
    %31 = tpu.transpose %30, [1, 0, 2] : vector<8x4x8xf32> -> vector<4x8x8xf32>
    %32 = arith.truncf %31 : vector<4x8x8xf32> to vector<4x8x8xbf16>
    "tpu.trace_start"() <{level = 10 : i32, message = "hqd,hkd->hqk"}> : () -> ()
    %cst_19 = arith.constant dense<0.000000e+00> : vector<4x8x8xf32>
    %33 = tpu.matmul %26, %29, %cst_19 {dimension_numbers = #tpu.dot_dimension_numbers<[2], [2], [1], [1], [0, 0, 0, 1, 1, 1], [0], [0]>} : vector<4x8x8xbf16>, vector<4x8x8xbf16>, vector<4x8x8xf32> -> vector<4x8x8xf32>
    "tpu.trace_stop"() : () -> ()
    %cst_20 = arith.constant dense<0xFF800000> : vector<4x8xf32>
    %34 = vector.multi_reduction <maximumf>, %33, %cst_20 [2] : vector<4x8x8xf32> to vector<4x8xf32>
    %35 = vector.shape_cast %34 : vector<4x8xf32> to vector<4x8x1xf32>
    %36 = vector.broadcast %35 : vector<4x8x1xf32> to vector<4x8x8xf32>
    %37 = arith.subf %33, %36 : vector<4x8x8xf32>
    %38 = math.exp %37 : vector<4x8x8xf32>
    %cst_21 = arith.constant dense<0.000000e+00> : vector<4x8xf32>
    %39 = vector.multi_reduction <add>, %38, %cst_21 [2] : vector<4x8x8xf32> to vector<4x8xf32>
    %40 = vector.shape_cast %39 : vector<4x8xf32> to vector<4x8x1xf32>
    %41 = tpu.reciprocal %40 {approx = true} : vector<4x8x1xf32> -> vector<4x8x1xf32>
    %42 = vector.broadcast %41 : vector<4x8x1xf32> to vector<4x8x8xf32>
    %43 = arith.mulf %38, %42 : vector<4x8x8xf32>
    %44 = arith.truncf %43 : vector<4x8x8xf32> to vector<4x8x8xbf16>
    "tpu.trace_start"() <{level = 10 : i32, message = "hqk,hkd->hqd"}> : () -> ()
    %cst_22 = arith.constant dense<0.000000e+00> : vector<4x8x8xf32>
    %45 = tpu.matmul %44, %32, %cst_22 {dimension_numbers = #tpu.dot_dimension_numbers<[2], [1], [1], [2], [0, 0, 0, 1, 1, 2], [0], [0]>} : vector<4x8x8xbf16>, vector<4x8x8xbf16>, vector<4x8x8xf32> -> vector<4x8x8xf32>
    "tpu.trace_stop"() : () -> ()
    %46 = tpu.transpose %45, [1, 0, 2] : vector<4x8x8xf32> -> vector<8x4x8xf32>
    %47 = vector.shape_cast %46 : vector<8x4x8xf32> to vector<8x32xf32>
    %48 = arith.truncf %47 : vector<8x32xf32> to vector<8x32xbf16>
    %c0_23 = arith.constant 0 : index
    %c0_24 = arith.constant 0 : index
    %49 = vector.load %arg9[%c0_23, %c0_24] : memref<32x32xbf16, #tpu.memory_space<vmem>>, vector<32x32xbf16>
    %cst_25 = arith.constant dense<0.000000e+00> : vector<8x32xf32>
    %50 = tpu.matmul %48, %49, %cst_25 {dimension_numbers = #tpu.dot_dimension_numbers<[1], [0], [0], [1], [0, 0, 1, 1], [], []>} : vector<8x32xbf16>, vector<32x32xbf16>, vector<8x32xf32> -> vector<8x32xf32>
    %c0_26 = arith.constant 0 : index
    %c0_27 = arith.constant 0 : index
    %51 = vector.load %arg10[%c0_26, %c0_27] : memref<1x32xf32, #tpu.memory_space<vmem>>, vector<1x32xf32>
    %52 = vector.broadcast %51 : vector<1x32xf32> to vector<8x32xf32>
    %53 = arith.addf %50, %52 : vector<8x32xf32>
    %c0_28 = arith.constant 0 : index
    %c0_29 = arith.constant 0 : index
    %c0_30 = arith.constant 0 : index
    %54 = vector.load %arg11[%c0_28, %c0_29, %c0_30] : memref<1x8x32xf32, #tpu.memory_space<vmem>>, vector<1x8x32xf32>
    %55 = vector.shape_cast %54 : vector<1x8x32xf32> to vector<8x32xf32>
    %56 = vector.shape_cast %53 : vector<8x32xf32> to vector<1x8x32xf32>
    tpu.vector_store %arg11[%c0_28, %c0_29, %c0_30], %56 {strides = array<i32>} : memref<1x8x32xf32, #tpu.memory_space<vmem>>, vector<1x8x32xf32>,
    return
  }
  func.func @transform_0(%arg0: i32, %arg1: i32) -> (i32, i32, i32) {
    %c0_i32 = arith.constant 0 : i32
    %c0_i32_0 = arith.constant 0 : i32
    %c0_i32_1 = arith.constant 0 : i32
    return %arg0, %c0_i32, %c0_i32_0 : i32, i32, i32
  }
  func.func @transform_1(%arg0: i32, %arg1: i32) -> (i32, i32) {
    %c0_i32 = arith.constant 0 : i32
    %c0_i32_0 = arith.constant 0 : i32
    %c0_i32_1 = arith.constant 0 : i32
    return %c0_i32, %c0_i32_0 : i32, i32
  }
  func.func @transform_2(%arg0: i32, %arg1: i32) -> (i32, i32) {
    %c0_i32 = arith.constant 0 : i32
    %c0_i32_0 = arith.constant 0 : i32
    %c0_i32_1 = arith.constant 0 : i32
    return %c0_i32, %c0_i32_0 : i32, i32
  }
  func.func @transform_3(%arg0: i32, %arg1: i32) -> (i32, i32) {
    %c0_i32 = arith.constant 0 : i32
    %c0_i32_0 = arith.constant 0 : i32
    %c0_i32_1 = arith.constant 0 : i32
    return %c0_i32, %c0_i32_0 : i32, i32
  }
  func.func @transform_4(%arg0: i32, %arg1: i32) -> (i32, i32) {
    %c0_i32 = arith.constant 0 : i32
    %c0_i32_0 = arith.constant 0 : i32
    %c0_i32_1 = arith.constant 0 : i32
    return %c0_i32, %c0_i32_0 : i32, i32
  }
  func.func @transform_5(%arg0: i32, %arg1: i32) -> (i32, i32) {
    %c0_i32 = arith.constant 0 : i32
    %c0_i32_0 = arith.constant 0 : i32
    %c0_i32_1 = arith.constant 0 : i32
    return %c0_i32, %c0_i32_0 : i32, i32
  }
  func.func @transform_6(%arg0: i32, %arg1: i32) -> (i32, i32) {
    %c0_i32 = arith.constant 0 : i32
    %c0_i32_0 = arith.constant 0 : i32
    %c0_i32_1 = arith.constant 0 : i32
    return %c0_i32, %c0_i32_0 : i32, i32
  }
  func.func @transform_7(%arg0: i32, %arg1: i32) -> (i32, i32) {
    %c0_i32 = arith.constant 0 : i32
    %c0_i32_0 = arith.constant 0 : i32
    %c0_i32_1 = arith.constant 0 : i32
    return %c0_i32, %c0_i32_0 : i32, i32
  }
  func.func @transform_8(%arg0: i32, %arg1: i32) -> (i32, i32) {
    %c0_i32 = arith.constant 0 : i32
    %c0_i32_0 = arith.constant 0 : i32
    %c0_i32_1 = arith.constant 0 : i32
    return %c0_i32, %c0_i32_0 : i32, i32
  }
  func.func @transform_9(%arg0: i32, %arg1: i32) -> (i32, i32, i32) {
    %c0_i32 = arith.constant 0 : i32
    %c0_i32_0 = arith.constant 0 : i32
    return %arg0, %arg1, %c0_i32 : i32, i32, i32
  }
}

</mosaic_0001>

<bundles_post_ra>
// kernel: tpu_custom_call.1
= control target key start
LH: loop header
LB: loop body
LE: loop exit
PB: predicated region body
PF: predicated region fallthrough
CT: control target
= control target key end

     0   :  { %s2834_s0 = inlined_call_operand.hbm [shape: bf16[2,8,32], index: 0, kind: input, shape index: {}]   ;;  %s2835_s1 = inlined_call_operand.hbm [shape: bf16[32,32], index: 1, kind: input, shape index: {}]   ;;  %s2836_s2 = inlined_call_operand.vmem [shape: f32[1,32], index: 2, kind: input, shape index: {}]   ;;  %s2837_s3 = inlined_call_operand.hbm [shape: bf16[32,32], index: 3, kind: input, shape index: {}]   ;;  %s2838_s4 = inlined_call_operand.vmem [shape: f32[1,32], index: 4, kind: input, shape index: {}]   ;;  %s2839_s5 = inlined_call_operand.hbm [shape: bf16[32,32], index: 5, kind: input, shape index: {}]   ;;  %s2840_s6 = inlined_call_operand.vmem [shape: f32[1,32], index: 6, kind: input, shape index: {}]   ;;  %s2841_s7 = inlined_call_operand.hbm [shape: bf16[32,32], index: 7, kind: input, shape index: {}]   ;;  %s2842_s8 = inlined_call_operand.vmem [shape: f32[1,32], index: 8, kind: input, shape index: {}]   ;;  %s2843_s9 = inlined_call_operand.hbm [shape: f32[2,8,32], index: 9, kind: output, shape index: {}]  }
   0x1   :  { %2846 = sst [smem:[#allocation18_spill]] %s2835_s1 }
   0x2   :  { %2847 = sst [smem:[#allocation19_spill]] %s2837_s3 }
   0x3   :  { %2848 = sst [smem:[#allocation20_spill]] %s2839_s5 }
   0x4   :  { %2849 = sst [smem:[#allocation21_spill]] %s2841_s7 }
   0x5   :  { %14 = vsyncpa [#allocation3], 0 }
   0x6   :  { %16 = vsyncpa [#allocation3 + $0x1], 0 }
   0x7   :  { %17 = vsyncpa [#allocation6], 0 }
   0x8   :  { %18 = vsyncpa [#allocation9], 0 }
   0x9   :  { %19 = vsyncpa [#allocation4], 0 }
   0xa   :  { %21 = vsyncpa [#allocation4 + $0x1], 0  ;;  %s2438_s30 = smov 0   ;;  %s2440_s10 = smov 0  }
   0xb   :  { %s2442_s11 = smov 0   ;;  %s2444_s12 = smov 0  }
   0xc   :  { %s2446_s13 = smov 0   ;;  %s2448_s14 = smov 0  }
   0xd LB: > { %2850 = sst [smem:[#allocation16_spill]] %s2364_s13  ;;  %s1848_s15 = sadd.s32 4294967295, %s2368_s14   ;;  %s2368_s14 = sphi %s2448_s14, %s27_s14   ;;  %s2364_s13 = sphi %s2446_s13, %s2867_s13   ;;  %s2360_s12 = sphi %s2444_s12, %s2866_s12   ;;  %s2356_s11 = sphi %s2442_s11, %s2870_s11   ;;  %s2352_s10 = sphi %s2440_s10, %s2869_s10   ;;  %s2348_s30 = sphi %s2438_s30, %s2868_s30  }
   0xe   : > { %p1850_p0 = scmp.ge.s32.totalorder %s2368_s14, 1  ;;  %p2472_p1 = scmp.eq.s32.totalorder %s1848_s15, 0 }
   0xf   : > { %p266_p2 = scmp.lt.s32.totalorder %s2368_s14, 3  ;;  %s2370_s18 = smov [#allocation5]  }
  0x10   : > { %s278_s19 = sshll.u32 %s2370_s18, 4  ;;  %s2371_s21 = smov [#allocation8]   ;;  %s279_s19 = int_to_ptr.vmem [resolvable:$true] %s278_s19 }
  0x11   : > { %p2477_p3 = pnand %p1850_p0, %p266_p2  ;;  %s310_s22 = sshll.u32 %s2371_s21, 4  ;;  %s311_s22 = int_to_ptr.vmem [resolvable:$true] %s310_s22 }
  0x12   : > { %s2372_s23 = smov [#allocation7]   ;;  %s2159_s25 = scalar_lea.vmem %s279_s19, 256 }
  0x13   : > { %p2029_p4 = pneg %p2477_p3  ;;  %s294_s24 = sshll.u32 %s2372_s23, 4  ;;  %s295_s24 = int_to_ptr.vmem [resolvable:$true] %s294_s24 }
  0x14   : > { %p2160_p8 = scmp.ne.s32.totalorder %s279_s19, %s2159_s25  ;;  %p2167_p11 = scmp.lt.s32.totalorder %s279_s19, %s279_s19 }
  0x15   : > { %p2486_p6 = pnand %p2029_p4, %p2472_p1  ;;  %p2168_p12 = scmp.lt.s32.totalorder %s2159_s25, %s2159_s25 }
  0x17   : > { %p2150_p7 = pneg %p2486_p6  ;;  %p2169_p13 = por %p2168_p12, %p2167_p11 }
  0x19   : > { %p2162_p9 = pnand %p2160_p8, %p2150_p7 }
  0x1b   : > { %p2163_p10 = pneg %p2162_p9 }
  0x1d   : > { %p2170_p0 = pnand %p2169_p13, %p2163_p10 }
  0x1f   : > { %2173 = shalt.err (!%p2170_p0)
}
  0x20   : > { %s2373_s26 = smov 64   ;;  %s2374_s27 = smov 4  }
  0x21   : > { %s2854_s1 = sld [smem:[#allocation18_spill]]  ;;  %s2185_s18 = scalar_lea.vmem %s311_s22, 256 }
  0x22   : > { %p2186_p2 = scmp.ne.s32.totalorder %s311_s22, %s2185_s18  ;;  %p2193_p9 = scmp.lt.s32.totalorder %s311_s22, %s311_s22 }
  0x23   : > { %p2194_p10 = scmp.lt.s32.totalorder %s2185_s18, %s2185_s18 }
  0x24   : > { %p2188_p4 = pnand %p2186_p2, %p2150_p7 }
  0x25   : > { %p2195_p11 = por %p2194_p10, %p2193_p9 }
  0x26   : > { %p2189_p8 = pneg %p2188_p4 }
  0x27   : > { %2032 = dma.hbm_to_vmem [thread:$0]  (!%p2486_p6), %s2854_s1, 256, %s279_s19, [#allocation6], %s2373_s26, %s2373_s26, %s2374_s27  }
  0x28   : > { %p2196_p12 = pnand %p2195_p11, %p2189_p8 }
  0x2a   : > { %2199 = shalt.err (!%p2196_p12)
}
  0x2b   : > { %s2855_s5 = sld [smem:[#allocation20_spill]]  ;;  %s2211_s19 = scalar_lea.vmem %s295_s24, 256 }
  0x2c   : > { %p2212_p13 = scmp.ne.s32.totalorder %s295_s24, %s2211_s19  ;;  %p2219_p4 = scmp.lt.s32.totalorder %s295_s24, %s295_s24 }
  0x2d   : > { %p2220_p8 = scmp.lt.s32.totalorder %s2211_s19, %s2211_s19 }
  0x2e   : > { %p2214_p0 = pnand %p2212_p13, %p2150_p7 }
  0x2f   : > { %p2221_p9 = por %p2220_p8, %p2219_p4 }
  0x30   : > { %p2215_p2 = pneg %p2214_p0 }
  0x31   : > { %2038 = dma.hbm_to_vmem [thread:$0]  (!%p2486_p6), %s2855_s5, 256, %s311_s22, [#allocation9], %s2373_s26, %s2373_s26, %s2374_s27  }
  0x32   : > { %p2222_p10 = pnand %p2221_p9, %p2215_p2 }
  0x34   : > { %2225 = shalt.err (!%p2222_p10)
}
  0x35   : > { %s2856_s3 = sld [smem:[#allocation19_spill]]  ;;  %s2375_s22 = smov [#allocation10]  }
  0x36   : > { %s326_s29 = sshll.u32 %s2375_s22, 4  ;;  %s327_s29 = int_to_ptr.vmem [resolvable:$true] %s326_s29 }
  0x37   : > { %s2237_s18 = scalar_lea.vmem %s327_s29, 256  ;;  %p2245_p0 = scmp.lt.s32.totalorder %s327_s29, %s327_s29 }
  0x38   : > { %p2238_p11 = scmp.ne.s32.totalorder %s327_s29, %s2237_s18  ;;  %p2246_p2 = scmp.lt.s32.totalorder %s2237_s18, %s2237_s18 }
  0x3a   : > { %p2240_p12 = pnand %p2238_p11, %p2150_p7  ;;  %p2247_p4 = por %p2246_p2, %p2245_p0 }
  0x3b   : > { %2035 = dma.hbm_to_vmem [thread:$0]  (!%p2486_p6), %s2856_s3, 256, %s295_s24, [#allocation6], %s2373_s26, %s2373_s26, %s2374_s27  }
  0x3c   : > { %p2241_p13 = pneg %p2240_p12 }
  0x3e   : > { %p2248_p8 = pnand %p2247_p4, %p2241_p13 }
  0x40   : > { %2251 = shalt.err (!%p2248_p8)
}
  0x41   : > { %s2857_s7 = sld [smem:[#allocation21_spill]]  ;;  %s1849_s20 = sadd.s32 4294967294, %s2368_s14  }
  0x42   : > { %s39_s23 = sadd.s32 1, %s2364_s13  ;;  %s46_s19 = sadd.s32 1, %s2356_s11 }
  0x43   : > { %p41_p7 = scmp.ge.s32.totalorder %s39_s23, 2  ;;  %p53_p9 = scmp.ne.s32.totalorder %s2356_s11, %s2352_s10 }
  0x44   : > { %p54_p10 = scmp.eq.s32.totalorder %s2368_s14, 0  ;;  %p59_p12 = scmp.ne.s32.totalorder %s2352_s10, %s2348_s30 }
  0x45   : > { %s2872_s23 = smov (%p41_p7, %s39_s23), 0  ;;  %p259_p4 = scmp.eq.s32.totalorder %s1849_s20, 1 }
  0x46   : > { %2858 = sst [smem:[#allocation17_spill]] %s2872_s23  ;;  %p2544_p11 = por %p54_p10, %p53_p9 }
  0x47   : > { %2041 = dma.hbm_to_vmem [thread:$0]  (!%p2486_p6), %s2857_s7, 256, %s327_s29, [#allocation9], %s2373_s26, %s2373_s26, %s2374_s27  }
  0x48   : > { %s43_s26 = ssub.s32 %s2364_s13, %s2872_s23  ;;  %p253_p6 = scmp.eq.s32.totalorder %s1848_s15, 1 }
  0x49   : > { %p44_p13 = scmp.eq.s32.totalorder %s43_s26, 0  ;;  %p2556_p0 = por %p2472_p1, %p59_p12 }
  0x4a   : > { %p2560_p2 = por %p253_p6, %p53_p9  ;;  %p2567_p8 = por %p259_p4, %p59_p12 }
  0x4b   : > { %s2565_s22 = scalar_select %p44_p13, %s2356_s11, %s46_s19  }
  0x4c   : > { %s2862_s29 = scalar_select %p2567_p8, 1, 0 }
  0x4d   : > { %p2054_p7 = scmp.lt.s32.totalorder %s2368_s14, 2  ;;  %s343_s18 = sand.u32 1, %s2356_s11  }
  0x4e   : > { %s1857_s15 = sshll.u32 %s2364_s13, 6  ;;  %s1856_s24 = sshll.u32 %s343_s18, 2 }
  0x4f   : > { %s352_s1 = scalar_lea.hbm %s2834_s0, %s1857_s15  ;;  %s347_s3 = scalar_lea.vmem [#allocation2], %s1856_s24 }
  0x50   : > { %s354_s5 = sshll.u32 %s347_s3, 4  ;;  %p2579_p9 = pnand %p2054_p7, %p2544_p11  ;;  %s355_s5 = int_to_ptr.vmem [resolvable:$true] %s354_s5 }
  0x51   : > { %s344_s20 = scalar_lea.sflag [#allocation3], %s343_s18  ;;  %s2265_s19 = scalar_lea.vmem %s355_s5, 64 }
  0x52   : > { %p2254_p10 = pneg %p2579_p9  ;;  %p2266_p12 = scmp.ne.s32.totalorder %s355_s5, %s2265_s19 }
  0x53   : > { %s2376_s23 = smov [#allocation2]  }
  0x54   : > { %p2268_p6 = pnand %p2266_p12, %p2254_p10  ;;  %s2270_s13 = sshll.u32 %s2376_s23, 4  ;;  %s2271_s13 = int_to_ptr.vmem [resolvable:$false] %s2270_s13 }
  0x55   : > { %s2272_s15 = scalar_lea.vmem %s2271_s13, 128  ;;  %p2273_p4 = scmp.lt.s32.totalorder %s355_s5, %s2271_s13 }
  0x56   : > { %p2269_p13 = pneg %p2268_p6  ;;  %p2274_p5 = scmp.lt.s32.totalorder %s2272_s15, %s2265_s19 }
  0x58   : > { %p2275_p8 = por %p2274_p5, %p2273_p4 }
  0x5a   : > { %p2276_p11 = pnand %p2275_p8, %p2269_p13 }
  0x5c   : > { %2279 = shalt.err (!%p2276_p11)
}
  0x5d   : > { %2045 = dma.hbm_to_vmem [thread:$0]  (!%p2579_p9), %s352_s1, 64, %s355_s5, %s344_s20  }
  0x5e   : > { %363 = sbr.rel (%p2477_p3) target bundleno = 1559 (0x617), region = 56  ;;  %s2590_s3 = sand.u32 (!%p2477_p3), 1, %s2352_s10  }
  0x5f   : > { %s1859_s23 = sshll.u32 (!%p2477_p3), %s2590_s3, 2  ;;  %s366_s25 = scalar_lea.sflag (!%p2477_p3), [#allocation3], %s2590_s3 }
  0x60   : > { %s369_s18 = scalar_lea.vmem (!%p2477_p3), [#allocation2], %s1859_s23 }
  0x63   : > { %2331 = dma.done.wait (%p2556_p0), %s366_s25, 64  }
  0x64   : > { %2333 = vsyncadd (%p2556_p0), %s366_s25, 4294967232 }
  0x65   : > { %2335 = dma.done.wait (%p2472_p1), [#allocation6], 512  }
  0x66   : > { %2337 = vsyncadd (%p2472_p1), [#allocation6], 4294966784 }
  0x67   : > { %2339 = dma.done.wait (%p2472_p1), [#allocation9], 512  }
  0x68   : > { %2341 = vsyncadd (%p2472_p1), [#allocation9], 4294966784  ;;  %v2377_v0 = vmov 0.0   ;;  %vm2378_vm0 = vmmov 0   ;;  %v2124_v1 = vld [vmem:[#allocation7 + $0x8] sm:$0xff]   ;;  %v2125_v2 = vld [vmem:[#allocation5 + $0x8] sm:$0xff]   ;;  %v640_v24 = vlaneseq }
  0x69   : > { %1937 = vmatprep.subr.bf16.mxu1 %v2377_v0  ;;  %1929 = vmatprep.subr.bf16.mxu0 %v2377_v0  ;;  %v2126_v3 = vld [vmem:[#allocation7] sm:$0xff]   ;;  %v2127_v4 = vld [vmem:[#allocation5] sm:$0xff]   ;;  %v421_v5 = vld [vmem:[%s369_s18] sm:$0xf]  ;;  %vm451_vm1 = vcmask 261120   ;;  %s2379_s16 = smov 104  }
  0x6a   : > { %1941 = vmatprep.mubr.msk.bf16.mxu1 %vm2378_vm0, %v2377_v0  ;;  %1933 = vmatprep.mubr.msk.bf16.mxu0 %vm2378_vm0, %v2377_v0  ;;  %v427_v6 = vld [vmem:[%s369_s18] sm:$0xf]  ;;  %v2128_v10 = vld [vmem:[#allocation8 + $0x8] sm:$0xff]   ;;  %s2380_s17 = smov 120   ;;  %v2129_v18 = vld [vmem:[#allocation8] sm:$0xff]   ;;  %s2381_s27 = smov 112  }
  0x6b   : > { %1938 = vmatpush3.bf16.msra.mxu1 %v2124_v1  ;;  %1930 = vmatpush3.bf16.msra.mxu0 %v2125_v2  ;;  %v1869_v7 = vld [vmem:[%s2838_s4] ss:$0 sm:$0xff]  ;;  %v2382_v22 = vmov 1983009808   ;;  %v2383_v25 = vmov 1934713408  }
  0x6c   : > { %1939 = vmatprep.subr.bf16.mxu1 %v2377_v0  ;;  %1931 = vmatprep.subr.bf16.mxu0 %v2377_v0  ;;  %v1865_v8 = vld [vmem:[%s2836_s2] ss:$0 sm:$0xff]  ;;  %v638_v23 = vunpack.c.l.s4 %v2382_v22  ;;  %v670_v26 = vunpack.c.l.s4 %v2383_v25  ;;  %v641_v28 = vshrl.u32 %v640_v24, 7  ;;  %vm1075_vm2 = vcmask 64512   ;;  %s2384_s26 = smov 16   ;;  %s2385_s20 = smov 8  }
  0x6d   : > { %vm1311_vm3 = vcmask 1043456   ;;  %s2386_s19 = smov 24   ;;  %vm1642_vm4 = vcmask 130048   ;;  %vm1644_vm5 = vcmask 195584   ;;  %s1864_s15 = sshll.u32 %s2590_s3, 3 }
  0x6e   : > { %v639_v27 = vunpack.c.0.s8 %v638_v23  ;;  %v671_v31 = vunpack.c.0.s8 %v670_v26  ;;  %s1898_s18 = sshll.u32 %s2360_s12, 7  ;;  %s419_s1 = scalar_lea.vmem [#allocation11], %s1864_s15 }
  0x6f   : > { %1940 = vmatpush3.bf16.msra.mxu1 %v2126_v3  ;;  %1932 = vmatpush3.bf16.msra.mxu0 %v2127_v4  ;;  %s1729_s5 = sshll.u32 %s419_s1, 4  ;;  %s2787_s5 = int_to_ptr.vmem [resolvable:$true] %s1729_s5 }
  0x70   : > { %1953 = vmatprep.subr.bf16.mxu1 %v2377_v0  ;;  %1945 = vmatprep.subr.bf16.mxu0 %v2377_v0  ;;  %v2639_v32 = vsub.s32 %v639_v27, %v641_v28  ;;  %v2641_v39 = vsub.s32 %v671_v31, %v641_v28  ;;  %s2280_s12 = scalar_lea.vmem %s2787_s5, 128 }
  0x71   : > { %p2281_p1 = scmp.ne.s32.totalorder %s2787_s5, %s2280_s12 }
  0x72   : > { %1942 = vmatmul.mubr.msk.bf16.vlgmr.msra.gmra.mxu1 %vm451_vm1, %v421_v5  ;;  %1934 = vmatmul.mubr.msk.bf16.vlgmr.msra.gmra.mxu0 %vm451_vm1, %v427_v6 }
  0x73   : > { %1955 = vmatprep.mubr.msk.bf16.mxu1 %vm2378_vm0, %v2377_v0  ;;  %1949 = vmatprep.mubr.msk.bf16.mxu0 %vm2378_vm0, %v2377_v0  ;;  %p2282_p3 = pnand %p2281_p1, %p2560_p2 }
  0x74   : > { %1946 = vmatpush3.bf16.msra.mxu0 %v2128_v10 }
  0x75   : > { %1947 = vmatprep.subr.bf16.mxu0 %v2377_v0  ;;  %p2283_p5 = pneg %p2282_p3 }
  0x78   : > { %1948 = vmatpush3.bf16.msra.mxu0 %v2129_v18 }
  0x79   : > { %1959 = vmatprep.subr.bf16.mxu0 %v2377_v0 }
  0x7b   : > { %1950 = vmatmul.mubr.msk.bf16.vlgmr.msra.gmra.mxu0 %vm451_vm1, %v421_v5 }
  0x7c   : > { %1961 = vmatprep.mubr.msk.bf16.mxu0 %vm2378_vm0, %v2377_v0 }
 0x132   : > { %v555_v9 = vpop.f32.mrf.mxu1  ;;  %v489_v12 = vpop.f32.mrf.mxu0 }
 0x133   : > { %v556_v11 = vadd.f32 %v1869_v7, %v555_v9  ;;  %v490_v13 = vadd.f32 %v1865_v8, %v489_v12 }
 0x134   : > { %v1943_v14 = vpop.f32.mrf.mxu1  ;;  %v1935_v15 = vpop.f32.mrf.mxu0 }
 0x135   : > { %782 = vrot.lane.b32.xlu1 %v556_v11, %s2379_s16  ;;  %776 = vrot.lane.b32.xlu0 %v556_v11, %s2380_s17  ;;  %v624_v16 = vmul.f32 0.35355338, %v490_v13 }
 0x136   : > { %v558_v17 = vpop.f32.mrf.mxu1  ;;  %v492_v19 = vpop.f32.mrf.mxu0 }
 0x138   : > { %v1944_v20 = vpop.f32.mrf.mxu1  ;;  %v1936_v21 = vpop.f32.mrf.mxu0 }
 0x139   : > { %626 = vrot.lane.b32.xlu1 %v624_v16, %s2380_s17  ;;  %779 = vrot.lane.b32.xlu0 %v556_v11, %s2381_s27 }
 0x13d   : > { %632 = vrot.lane.b32.xlu1 %v624_v16, %s2379_s16  ;;  %629 = vrot.lane.b32.xlu0 %v624_v16, %s2381_s27 }
 0x1a7   : > { %v783_v29 = vpop.permute.xlu1 %782  ;;  %v777_v30 = vpop.permute.xlu0 %776 }
 0x1a8   : > { %v801_v33 = vcombine.low %v777_v30, %v783_v29  ;;  %v802_v34 = vcombine.high %v777_v30, %v783_v29 }
 0x1aa   : > { %v809_v40 = vrot.slane %v801_v33, %v2639_v32  ;;  %v816_v41 = vrot.slane %v802_v34, %v2639_v32 }
 0x1ab   : > { %v627_v35 = vpop.permute.xlu1 %626  ;;  %v780_v36 = vpop.permute.xlu0 %779 }
 0x1ac   : > { %v785_v37 = vcombine.low %v556_v11, %v780_v36  ;;  %v786_v38 = vcombine.high %v556_v11, %v780_v36 }
 0x1ae   : > { %v793_v42 = vrot.slane %v785_v37, %v2639_v32  ;;  %v800_v43 = vrot.slane %v786_v38, %v2639_v32 }
 0x1af   : > { %v633_v44 = vpop.permute.xlu1 %632  ;;  %v630_v45 = vpop.permute.xlu0 %629 }
 0x1b0   : > { %v817_v46 = vcombine.low %v793_v42, %v809_v40  ;;  %v818_v47 = vcombine.high %v793_v42, %v809_v40  ;;  %v833_v48 = vcombine.low %v800_v43, %v816_v41  ;;  %v834_v49 = vcombine.high %v800_v43, %v816_v41 }
 0x1b1   : > { %v651_v50 = vcombine.low %v627_v35, %v633_v44  ;;  %v652_v51 = vcombine.high %v627_v35, %v633_v44  ;;  %v635_v52 = vcombine.low %v624_v16, %v630_v45  ;;  %v636_v53 = vcombine.high %v624_v16, %v630_v45 }
 0x1b2   : > { %v825_v54 = vrot.slane %v817_v46, %v2641_v39  ;;  %v832_v55 = vrot.slane %v818_v47, %v2641_v39  ;;  %v841_v56 = vrot.slane %v833_v48, %v2641_v39  ;;  %v848_v57 = vrot.slane %v834_v49, %v2641_v39 }
 0x1b3   : > { %v659_v58 = vrot.slane %v651_v50, %v2639_v32  ;;  %v666_v59 = vrot.slane %v652_v51, %v2639_v32  ;;  %v643_v60 = vrot.slane %v635_v52, %v2639_v32  ;;  %v650_v61 = vrot.slane %v636_v53, %v2639_v32 }
 0x1b4   : > { %v853_v62 = vcombine.low %v825_v54, %v832_v55  ;;  %v1879_v63 = vcombine.high %v825_v54, %v832_v55  ;;  %v869_v1 = vcombine.low %v841_v56, %v848_v57  ;;  %v1880_v2 = vcombine.high %v841_v56, %v848_v57 }
 0x1b5   : > { %v667_v3 = vcombine.low %v643_v60, %v659_v58  ;;  %v668_v4 = vcombine.high %v643_v60, %v659_v58  ;;  %v683_v5 = vcombine.low %v650_v61, %v666_v59  ;;  %v684_v6 = vcombine.high %v650_v61, %v666_v59  ;;  %v618_v61 = vpop.f32.mrf.mxu0 }
 0x1b6   : > { %v860_v7 = vrot.slane %v853_v62, %v2639_v32  ;;  %v868_v8 = vrot.slane %v1879_v63, %v2639_v32  ;;  %v876_v9 = vrot.slane %v869_v1, %v2639_v32  ;;  %v884_v10 = vrot.slane %v1880_v2, %v2639_v32 }
 0x1b7   : > { %v675_v11 = vrot.slane %v667_v3, %v2641_v39  ;;  %v682_v12 = vrot.slane %v668_v4, %v2641_v39  ;;  %v691_v13 = vrot.slane %v683_v5, %v2641_v39  ;;  %v698_v14 = vrot.slane %v684_v6, %v2641_v39  ;;  %v1951_v62 = vpop.f32.mrf.mxu0 }
 0x1b8   : > { %v885_v15 = vcombine.low %v860_v7, %v868_v8  ;;  %v901_v16 = vcombine.low %v876_v9, %v884_v10  ;;  %v886_v17 = vcombine.high %v860_v7, %v868_v8  ;;  %v902_v18 = vcombine.high %v876_v9, %v884_v10 }
 0x1b9   : > { %v703_v19 = vcombine.low %v675_v11, %v682_v12  ;;  %v1877_v20 = vcombine.high %v675_v11, %v682_v12  ;;  %v719_v21 = vcombine.low %v691_v13, %v698_v14  ;;  %v1878_v22 = vcombine.high %v691_v13, %v698_v14  ;;  %v621_v63 = vpop.f32.mrf.mxu0 }
 0x1ba   : > { %v893_v23 = vrot.slane %v885_v15, %v2641_v39  ;;  %v909_v24 = vrot.slane %v901_v16, %v2641_v39  ;;  %v900_v31 = vrot.slane %v886_v17, %v2641_v39  ;;  %v916_v33 = vrot.slane %v902_v18, %v2641_v39 }
 0x1bb   : > { %v710_v25 = vrot.slane %v703_v19, %v2639_v32  ;;  %v718_v26 = vrot.slane %v1877_v20, %v2639_v32  ;;  %v726_v27 = vrot.slane %v719_v21, %v2639_v32  ;;  %v734_v28 = vrot.slane %v1878_v22, %v2639_v32  ;;  %v1952_v1 = vpop.f32.mrf.mxu0  ;;  %v1873_v20 = vld [vmem:[%s2840_s6] ss:$0 sm:$0xff] }
 0x1bc   : > { %v917_v29 = vcombine.low %v893_v23, %v909_v24  ;;  %v918_v30 = vcombine.high %v893_v23, %v909_v24  ;;  %v919_v43 = vcombine.low %v900_v31, %v916_v33  ;;  %v920_v44 = vcombine.high %v900_v31, %v916_v33 }
 0x1bd   : > { %v735_v34 = vcombine.low %v710_v25, %v718_v26  ;;  %v751_v35 = vcombine.low %v726_v27, %v734_v28  ;;  %v736_v45 = vcombine.high %v710_v25, %v718_v26  ;;  %v752_v46 = vcombine.high %v726_v27, %v734_v28 }
 0x1be   : > { %v921_v36 = vpack.c.bf16 %v917_v29, %v917_v29  ;;  %v922_v37 = vpack.c.bf16 %v918_v30, %v918_v30  ;;  %v923_v49 = vpack.c.bf16 %v919_v43, %v919_v43  ;;  %v924_v50 = vpack.c.bf16 %v920_v44, %v920_v44 }
 0x1bf   : > { %v743_v38 = vrot.slane %v735_v34, %v2641_v39  ;;  %v759_v40 = vrot.slane %v751_v35, %v2641_v39  ;;  %v750_v53 = vrot.slane %v736_v45, %v2641_v39  ;;  %v766_v54 = vrot.slane %v752_v46, %v2641_v39 }
 0x1c0   : > { %v1080_v41 = vsel %vm1075_vm2, %v921_v36, 0  ;;  %v1126_v42 = vsel %vm1075_vm2, %v922_v37, 0  ;;  %v1172_v55 = vsel %vm1075_vm2, %v923_v49, 0  ;;  %v1218_v56 = vsel %vm1075_vm2, %v924_v50, 0 }
 0x1c1   : > { %1954 = vmatpush3.bf16.xpose.msra.mxu1 %v1080_v41  ;;  %1960 = vmatpush3.bf16.xpose.msra.mxu0 %v1126_v42  ;;  %v767_v47 = vcombine.low %v743_v38, %v759_v40  ;;  %v768_v48 = vcombine.high %v743_v38, %v759_v40  ;;  %v769_v57 = vcombine.low %v750_v53, %v766_v54 }
 0x1c2   : > { %1965 = vmatprep.subr.bf16.mxu1 %v2377_v0  ;;  %1971 = vmatprep.subr.bf16.mxu0 %v2377_v0  ;;  %v770_v58 = vcombine.high %v750_v53, %v766_v54  ;;  %v619_v23 = vadd.f32 %v1873_v20, %v618_v61 }
 0x1c3   : > { %v771_v51 = vpack.c.bf16 %v767_v47, %v767_v47  ;;  %v772_v52 = vpack.c.bf16 %v768_v48, %v768_v48  ;;  %v773_v59 = vpack.c.bf16 %v769_v57, %v769_v57 }
 0x1c4   : > { %v774_v60 = vpack.c.bf16 %v770_v58, %v770_v58 }
 0x1c8   : > { %1956 = vmatmul.mubr.msk.bf16.vlgmr.msra.gmra.mxu1 %vm1075_vm2, %v771_v51  ;;  %1962 = vmatmul.mubr.msk.bf16.vlgmr.msra.gmra.mxu0 %vm1075_vm2, %v772_v52 }
 0x1c9   : > { %1966 = vmatpush3.bf16.xpose.msra.mxu1 %v1172_v55  ;;  %1972 = vmatpush3.bf16.xpose.msra.mxu0 %v1218_v56 }
 0x1ca   : > { %1967 = vmatprep.mubr.msk.bf16.mxu1 %vm2378_vm0, %v2377_v0  ;;  %1973 = vmatprep.mubr.msk.bf16.mxu0 %vm2378_vm0, %v2377_v0 }
 0x1cb   : > { %1977 = vmatprep.subr.bf16.mxu1 %v2377_v0  ;;  %1983 = vmatprep.subr.bf16.mxu0 %v2377_v0 }
 0x1d0   : > { %1968 = vmatmul.mubr.msk.bf16.vlgmr.msra.gmra.mxu1 %vm1075_vm2, %v773_v59  ;;  %1974 = vmatmul.mubr.msk.bf16.vlgmr.msra.gmra.mxu0 %vm1075_vm2, %v774_v60 }
 0x1d1   : > { %1979 = vmatprep.mubr.msk.bf16.mxu1 %vm2378_vm0, %v2377_v0  ;;  %1985 = vmatprep.mubr.msk.bf16.mxu0 %vm2378_vm0, %v2377_v0 }
 0x288   : > { %v1116_v2 = vpop.f32.mrf.mxu1  ;;  %v1162_v3 = vpop.f32.mrf.mxu0 }
 0x289   : > { %v1263_v4 = vsel %vm1075_vm2, %v1162_v3, -inf  ;;  %v1260_v5 = vsel %vm1075_vm2, %v1116_v2, -inf }
 0x28a   : > { %1264 = vmax.xlane.f32.xlu1 %v1263_v4  ;;  %v1963_v6 = vpop.f32.mrf.mxu0  ;;  %1261 = vmax.xlane.f32.xlu0 %v1260_v5  ;;  %v1957_v7 = vpop.f32.mrf.mxu1 }
 0x28c   : > { %v1119_v8 = vpop.f32.mrf.mxu1  ;;  %v1165_v9 = vpop.f32.mrf.mxu0 }
 0x28e   : > { %v1958_v10 = vpop.f32.mrf.mxu1  ;;  %v1964_v11 = vpop.f32.mrf.mxu0 }
 0x290   : > { %v1208_v12 = vpop.f32.mrf.mxu1  ;;  %v1254_v13 = vpop.f32.mrf.mxu0 }
 0x291   : > { %v1266_v14 = vsel %vm1075_vm2, %v1208_v12, -inf  ;;  %v1269_v19 = vsel %vm1075_vm2, %v1254_v13, -inf }
 0x292   : > { %v1975_v15 = vpop.f32.mrf.mxu0  ;;  %1267 = vmax.xlane.f32.xlu0 %v1266_v14  ;;  %v1969_v16 = vpop.f32.mrf.mxu1 }
 0x294   : > { %v1211_v17 = vpop.f32.mrf.mxu1  ;;  %v1257_v18 = vpop.f32.mrf.mxu0 }
 0x296   : > { %v1976_v21 = vpop.f32.mrf.mxu0  ;;  %1270 = vmax.xlane.f32.xlu0 %v1269_v19  ;;  %v1970_v22 = vpop.f32.mrf.mxu1 }
 0x29b   : > { %926 = vrot.lane.b32.xlu1 %v619_v23, %s2380_s17  ;;  %s1715_s17 = scalar_lea.sflag [#allocation4], %s2590_s3 }
 0x313   : > { %v1265_v24 = vpop.xlane.xlu1 %1264  ;;  %v1262_v25 = vpop.xlane.xlu0 %1261 }
 0x314   : > { %v1273_v26 = vsub.f32 %v1162_v3, %v1265_v24  ;;  %v1272_v27 = vsub.f32 %v1116_v2, %v1262_v25 }
 0x316   : > { %v1278_v28 = vmul.f32 1.442695, %v1273_v26  ;;  %v1276_v29 = vmul.f32 1.442695, %v1272_v27 }
 0x317   : > { %v927_v46 = vpop.permute.xlu1 %926 }
 0x318   : > { %2132 = vpow2.f32 %v1278_v28 }
 0x319   : > { %2134 = vpow2.f32 %v1276_v29 }
 0x31b   : > { %v1268_v35 = vpop.xlane.xlu0 %1267 }
 0x31c   : > { %v1274_v38 = vsub.f32 %v1208_v12, %v1268_v35 }
 0x31e   : > { %v1280_v41 = vmul.f32 1.442695, %v1274_v38 }
 0x31f   : > { %v1271_v36 = vpop.xlane.xlu0 %1270 }
 0x320   : > { %v1275_v37 = vsub.f32 %v1254_v13, %v1271_v36 }
 0x322   : > { %v1282_v40 = vmul.f32 1.442695, %v1275_v37 }
 0x324   : > { %2136 = vpow2.f32 %v1282_v40 }
 0x325   : > { %v2703_v30 = vpop.eup %2132  ;;  %2138 = vpow2.f32 %v1280_v41 }
 0x326   : > { %v2705_v31 = vpop.eup %2134  ;;  %v1287_v33 = vsel %vm1075_vm2, %v2703_v30, 0.0 }
 0x327   : > { %v1284_v34 = vsel %vm1075_vm2, %v2705_v31, 0.0  ;;  %1288 = vadd.xlane.f32.xlu0 %v1287_v33 }
 0x328   : > { %1285 = vadd.xlane.f32.xlu1 %v1284_v34 }
 0x331   : > { %v2713_v42 = vpop.eup %2136 }
 0x332   : > { %v2715_v43 = vpop.eup %2138  ;;  %v1293_v44 = vsel %vm1075_vm2, %v2713_v42, 0.0 }
 0x333   : > { %v1290_v45 = vsel %vm1075_vm2, %v2715_v43, 0.0 }
 0x339   : > { %932 = vrot.lane.b32.xlu1 %v619_v23, %s2379_s16  ;;  %s2785_s16 = scalar_lea.hbm %s2843_s9, %s1898_s18 }
 0x33d   : > { %929 = vrot.lane.b32.xlu0 %v619_v23, %s2381_s27  ;;  %s2387_s27 = smov [#allocation11]  }
 0x33e   : > { %s2284_s24 = sshll.u32 %s2387_s27, 4  ;;  %s2285_s24 = int_to_ptr.vmem [resolvable:$false] %s2284_s24 }
 0x33f   : > { %s2286_s21 = scalar_lea.vmem %s2285_s24, 256  ;;  %p2287_p0 = scmp.lt.s32.totalorder %s2787_s5, %s2285_s24 }
 0x340   : > { %p2288_p8 = scmp.lt.s32.totalorder %s2286_s21, %s2280_s12 }
 0x342   : > { %p2289_p7 = por %p2288_p8, %p2287_p0 }
 0x344   : > { %p2290_p9 = pnand %p2289_p7, %p2283_p5 }
 0x35c   : > { %1294 = vadd.xlane.f32.xlu0 %v1293_v44 }
 0x35d   : > { %1291 = vadd.xlane.f32.xlu1 %v1290_v45 }
 0x3b0   : > { %v1289_v47 = vpop.xlane.xlu0 %1288 }
 0x3b1   : > { %v1286_v48 = vpop.xlane.xlu1 %1285  ;;  %2140 = vrcp.f32 %v1289_v47 }
 0x3b2   : > { %2142 = vrcp.f32 %v1286_v48 }
 0x3b4   : > { %v930_v49 = vpop.permute.xlu0 %929 }
 0x3b5   : > { %v933_v50 = vpop.permute.xlu1 %932  ;;  %v935_v51 = vcombine.low %v619_v23, %v930_v49  ;;  %v936_v52 = vcombine.high %v619_v23, %v930_v49 }
 0x3b6   : > { %v951_v53 = vcombine.low %v927_v46, %v933_v50  ;;  %v952_v54 = vcombine.high %v927_v46, %v933_v50 }
 0x3b7   : > { %v943_v55 = vrot.slane %v935_v51, %v2639_v32  ;;  %v950_v56 = vrot.slane %v936_v52, %v2639_v32 }
 0x3b8   : > { %v959_v57 = vrot.slane %v951_v53, %v2639_v32  ;;  %v966_v58 = vrot.slane %v952_v54, %v2639_v32 }
 0x3ba   : > { %v967_v59 = vcombine.low %v943_v55, %v959_v57  ;;  %v968_v60 = vcombine.high %v943_v55, %v959_v57  ;;  %v983_v61 = vcombine.low %v950_v56, %v966_v58  ;;  %v984_v62 = vcombine.high %v950_v56, %v966_v58 }
 0x3bc   : > { %v975_v63 = vrot.slane %v967_v59, %v2641_v39  ;;  %v982_v1 = vrot.slane %v968_v60, %v2641_v39  ;;  %v991_v2 = vrot.slane %v983_v61, %v2641_v39  ;;  %v998_v3 = vrot.slane %v984_v62, %v2641_v39 }
 0x3be   : > { %v1003_v4 = vcombine.low %v975_v63, %v982_v1  ;;  %v1881_v5 = vcombine.high %v975_v63, %v982_v1  ;;  %v1019_v6 = vcombine.low %v991_v2, %v998_v3  ;;  %v1882_v7 = vcombine.high %v991_v2, %v998_v3  ;;  %v2141_v16 = vpop.eup %2140 }
 0x3bf   : > { %v2143_v21 = vpop.eup %2142  ;;  %v1301_v29 = vmul.f32 %v2141_v16, %v2703_v30 }
 0x3c0   : > { %v1010_v8 = vrot.slane %v1003_v4, %v2639_v32  ;;  %v1018_v9 = vrot.slane %v1881_v5, %v2639_v32  ;;  %v1026_v10 = vrot.slane %v1019_v6, %v2639_v32  ;;  %v1034_v11 = vrot.slane %v1882_v7, %v2639_v32 }
 0x3c1   : > { %v1300_v28 = vmul.f32 %v2143_v21, %v2705_v31  ;;  %v1305_v38 = vpack.c.bf16 %v1301_v29, %v1301_v29 }
 0x3c2   : > { %v1035_v12 = vcombine.low %v1010_v8, %v1018_v9  ;;  %v1051_v13 = vcombine.low %v1026_v10, %v1034_v11  ;;  %v1036_v14 = vcombine.high %v1010_v8, %v1018_v9  ;;  %v1052_v15 = vcombine.high %v1026_v10, %v1034_v11 }
 0x3c3   : > { %v1304_v37 = vpack.c.bf16 %v1300_v28, %v1300_v28 }
 0x3c4   : > { %v1043_v17 = vrot.slane %v1035_v12, %v2641_v39  ;;  %v1059_v18 = vrot.slane %v1051_v13, %v2641_v39  ;;  %v1050_v19 = vrot.slane %v1036_v14, %v2641_v39  ;;  %v1066_v20 = vrot.slane %v1052_v15, %v2641_v39  ;;  %v2130_v12 = vld [vmem:[#allocation10 + $0x8] sm:$0xff]  }
 0x3c6   : > { %v1067_v22 = vcombine.low %v1043_v17, %v1059_v18  ;;  %v1068_v23 = vcombine.high %v1043_v17, %v1059_v18  ;;  %v1069_v24 = vcombine.low %v1050_v19, %v1066_v20  ;;  %v1070_v25 = vcombine.high %v1050_v19, %v1066_v20 }
 0x3c8   : > { %v1071_v26 = vpack.c.bf16 %v1067_v22, %v1067_v22  ;;  %v1072_v27 = vpack.c.bf16 %v1068_v23, %v1068_v23  ;;  %v1073_v35 = vpack.c.bf16 %v1069_v24, %v1069_v24  ;;  %v1074_v36 = vpack.c.bf16 %v1070_v25, %v1070_v25  ;;  %v2131_v22 = vld [vmem:[#allocation10] sm:$0xff]  }
 0x3ca   : > { %v1313_v33 = vsel %vm1311_vm3, %v1071_v26, 0  ;;  %v1359_v34 = vsel %vm1311_vm3, %v1072_v27, 0  ;;  %v1405_v30 = vsel %vm1311_vm3, %v1073_v35, 0  ;;  %v1451_v31 = vsel %vm1311_vm3, %v1074_v36, 0 }
 0x3cb   : > { %1978 = vmatpush3.bf16.msra.mxu1 %v1313_v33  ;;  %1984 = vmatpush3.bf16.msra.mxu0 %v1359_v34 }
 0x3cc   : > { %1989 = vmatprep.subr.bf16.mxu1 %v2377_v0  ;;  %1995 = vmatprep.subr.bf16.mxu0 %v2377_v0 }
 0x3ce   : > { %1980 = vmatmul.mubr.msk.bf16.vlgmr.msra.gmra.mxu1 %vm1075_vm2, %v1304_v37  ;;  %1986 = vmatmul.mubr.msk.bf16.vlgmr.msra.gmra.mxu0 %vm1075_vm2, %v1305_v38 }
 0x3cf   : > { %1990 = vmatpush3.bf16.msra.mxu1 %v1405_v30  ;;  %1996 = vmatpush3.bf16.msra.mxu0 %v1451_v31 }
 0x3d0   : > { %1991 = vmatprep.mubr.msk.bf16.mxu1 %vm2378_vm0, %v2377_v0  ;;  %1997 = vmatprep.mubr.msk.bf16.mxu0 %vm2378_vm0, %v2377_v0 }
 0x3d1   : > { %2001 = vmatprep.subr.bf16.mxu1 %v2377_v0 }
 0x3e5   : > { %v1295_v40 = vpop.xlane.xlu0 %1294 }
 0x3e6   : > { %v1292_v41 = vpop.xlane.xlu1 %1291  ;;  %2144 = vrcp.f32 %v1295_v40 }
 0x3e7   : > { %2146 = vrcp.f32 %v1292_v41 }
 0x3f3   : > { %v2145_v44 = vpop.eup %2144 }
 0x3f4   : > { %v2147_v45 = vpop.eup %2146  ;;  %v1303_v46 = vmul.f32 %v2145_v44, %v2713_v42 }
 0x3f5   : > { %v1302_v47 = vmul.f32 %v2147_v45, %v2715_v43 }
 0x3f6   : > { %v1307_v48 = vpack.c.bf16 %v1303_v46, %v1303_v46 }
 0x3f7   : > { %v1306_v49 = vpack.c.bf16 %v1302_v47, %v1302_v47  ;;  %v1893_v47 = vld [vmem:[%s2842_s8] ss:$0 sm:$0xff] }
 0x3f8   : > { %1998 = vmatmul.mubr.msk.bf16.vlgmr.msra.gmra.mxu0 %vm1075_vm2, %v1307_v48 }
 0x3f9   : > { %1992 = vmatmul.mubr.msk.bf16.vlgmr.msra.gmra.mxu1 %vm1075_vm2, %v1306_v49 }
 0x3fa   : > { %2005 = vmatprep.mubr.msk.bf16.mxu1 %vm2378_vm0, %v2377_v0  ;;  %2002 = vmatpush3.bf16.msra.mxu1 %v2130_v12 }
 0x3fb   : > { %2003 = vmatprep.subr.bf16.mxu1 %v2377_v0 }
 0x3fe   : > { %2004 = vmatpush3.bf16.msra.mxu1 %v2131_v22 }
 0x48e   : > { %v1349_v50 = vpop.f32.mrf.mxu1  ;;  %v1395_v51 = vpop.f32.mrf.mxu0 }
 0x490   : > { %v1981_v52 = vpop.f32.mrf.mxu1  ;;  %v1987_v53 = vpop.f32.mrf.mxu0 }
 0x492   : > { %v1352_v54 = vpop.f32.mrf.mxu1  ;;  %v1398_v55 = vpop.f32.mrf.mxu0 }
 0x494   : > { %v1982_v56 = vpop.f32.mrf.mxu1  ;;  %v1988_v57 = vpop.f32.mrf.mxu0 }
 0x4b8   : > { %v1487_v42 = vpop.f32.mrf.mxu0 }
 0x4b9   : > { %v1441_v58 = vpop.f32.mrf.mxu1  ;;  %v1509_v43 = vcombine.low %v1395_v51, %v1487_v42  ;;  %v1510_v59 = vcombine.high %v1395_v51, %v1487_v42 }
 0x4ba   : > { %v1493_v60 = vcombine.low %v1349_v50, %v1441_v58  ;;  %v1494_v61 = vcombine.high %v1349_v50, %v1441_v58  ;;  %v1999_v62 = vpop.f32.mrf.mxu0 }
 0x4bb   : > { %v1517_v63 = vrot.slane %v1509_v43, %v2639_v32  ;;  %v1524_v1 = vrot.slane %v1510_v59, %v2639_v32  ;;  %v1993_v2 = vpop.f32.mrf.mxu1 }
 0x4bc   : > { %v1501_v3 = vrot.slane %v1493_v60, %v2639_v32  ;;  %v1508_v4 = vrot.slane %v1494_v61, %v2639_v32  ;;  %v1490_v5 = vpop.f32.mrf.mxu0 }
 0x4bd   : > { %v1444_v6 = vpop.f32.mrf.mxu1 }
 0x4be   : > { %v1525_v7 = vcombine.low %v1501_v3, %v1517_v63  ;;  %v1526_v8 = vcombine.high %v1501_v3, %v1517_v63  ;;  %v1541_v9 = vcombine.low %v1508_v4, %v1524_v1  ;;  %v1542_v10 = vcombine.high %v1508_v4, %v1524_v1  ;;  %v2000_v11 = vpop.f32.mrf.mxu0 }
 0x4bf   : > { %v1994_v13 = vpop.f32.mrf.mxu1 }
 0x4c0   : > { %v1533_v14 = vrot.slane %v1525_v7, %v2641_v39  ;;  %v1540_v15 = vrot.slane %v1526_v8, %v2641_v39  ;;  %v1549_v16 = vrot.slane %v1541_v9, %v2641_v39  ;;  %v1556_v17 = vrot.slane %v1542_v10, %v2641_v39 }
 0x4c2   : > { %v1561_v18 = vcombine.low %v1533_v14, %v1540_v15  ;;  %v1891_v19 = vcombine.high %v1533_v14, %v1540_v15  ;;  %v1577_v20 = vcombine.low %v1549_v16, %v1556_v17  ;;  %v1892_v21 = vcombine.high %v1549_v16, %v1556_v17 }
 0x4c4   : > { %v1568_v23 = vrot.slane %v1561_v18, %v2639_v32  ;;  %v1576_v24 = vrot.slane %v1891_v19, %v2639_v32  ;;  %v1584_v25 = vrot.slane %v1577_v20, %v2639_v32  ;;  %v1592_v26 = vrot.slane %v1892_v21, %v2639_v32 }
 0x4c6   : > { %v1594_v27 = vcombine.high %v1568_v23, %v1576_v24  ;;  %v1610_v28 = vcombine.high %v1584_v25, %v1592_v26  ;;  %v1593_v29 = vcombine.low %v1568_v23, %v1576_v24  ;;  %v1609_v33 = vcombine.low %v1584_v25, %v1592_v26 }
 0x4c8   : > { %v1608_v0 = vrot.slane %v1594_v27, %v2641_v39  ;;  %v1624_v34 = vrot.slane %v1610_v28, %v2641_v39  ;;  %v1601_v35 = vrot.slane %v1593_v29, %v2641_v39  ;;  %v1617_v36 = vrot.slane %v1609_v33, %v2641_v39 }
 0x4ca   : > { %v1627_v37 = vcombine.low %v1608_v0, %v1624_v34  ;;  %v1626_v38 = vcombine.high %v1601_v35, %v1617_v36  ;;  %v1625_v30 = vcombine.low %v1601_v35, %v1617_v36  ;;  %v1628_v32 = vcombine.high %v1608_v0, %v1624_v34 }
 0x4cc   : > { %1634 = vrot.lane.b32.xlu1 %v1627_v37, %s2384_s26  ;;  %1630 = vrot.lane.b32.xlu0 %v1626_v38, %s2385_s20 }
 0x4d0   : > { %1638 = vrot.lane.b32.xlu1 %v1628_v32, %s2386_s19 }
 0x53e   : > { %v1635_v31 = vpop.permute.xlu1 %1634  ;;  %v1631_v40 = vpop.permute.xlu0 %1630 }
 0x53f   : > { %v1641_v41 = vsel %vm1075_vm2, %v1625_v30, %v1631_v40 }
 0x540   : > { %v1643_v39 = vsel %vm1642_vm4, %v1641_v41, %v1635_v31 }
 0x542   : > { %v1639_v44 = vpop.permute.xlu1 %1638 }
 0x543   : > { %v1645_v45 = vsel %vm1644_vm5, %v1643_v39, %v1639_v44 }
 0x544   : > { %v1646_v46 = vpack.c.bf16 %v1645_v45, %v1645_v45 }
 0x546   : > { %2006 = vmatmul.mubr.msk.bf16.vlgmr.msra.gmra.mxu1 %vm451_vm1, %v1646_v46 }
 0x606   : > { %v1707_v48 = vpop.f32.mrf.mxu1 }
 0x607   : > { %v1708_v49 = vadd.f32 %v1893_v47, %v1707_v48 }
 0x608   : > { %v2007_v50 = vpop.f32.mrf.mxu1 }
 0x609   : > { %1713 = vst.msk [vmem:[%s419_s1] sm:$0xff] %vm451_vm1, %v1708_v49 }
 0x60a   : > { %v1710_v51 = vpop.f32.mrf.mxu1 }
 0x60b   : > { %2293 = shalt.err (!%p2290_p9)
}
 0x60c   : > { %s2294_s26 = scalar_lea.hbm %s2785_s16, 128  ;;  %s2298_s19 = scalar_lea.hbm %s2843_s9, 256 }
 0x60d   : > { %p2295_p10 = scmp.ne.s32.totalorder %s2785_s16, %s2294_s26  ;;  %p2299_p13 = scmp.lt.s32.totalorder %s2785_s16, %s2843_s9 }
 0x60e   : > { %p2300_p4 = scmp.lt.s32.totalorder %s2298_s19, %s2294_s26 }
 0x60f   : > { %p2296_p12 = pnand %p2295_p10, %p2560_p2 }
 0x610   : > { %p2301_p11 = por %p2300_p4, %p2299_p13 }
 0x611   : > { %p2297_p6 = pneg %p2296_p12 }
 0x613   : > { %p2302_p1 = pnand %p2301_p11, %p2297_p6 }
 0x615   : > { %2305 = shalt.err (!%p2302_p1)
}
 0x616   : > { %2027 = dma.vmem_to_hbm [thread:$0]  (%p2560_p2), %s2787_s5, 128, %s2785_s16, %s1715_s17   ;;  %v2008_v52 = vpop.f32.mrf.mxu1 }
 0x617 PF: > { %s1741_s25 = sand.u32 1, %s2348_s30   ;;  %p2864_p3 = scmp.ne.s32.totalorder %s2862_s29, 0 }
 0x618   : > { %p2865_p5 = scmp.ge.s32.totalorder %s2368_s14, 2  ;;  %s1742_s18 = scalar_lea.sflag [#allocation4], %s1741_s25 }
 0x61a   : > { %p2047_p0 = pnand %p2865_p5, %p2864_p3 }
 0x61c   : > { %p2048_p8 = pneg %p2047_p0 }
 0x61e   : > { %2343 = dma.done.wait (%p2048_p8), %s1742_s18, 128  }
 0x61f   : > { %2345 = vsyncadd (%p2048_p8), %s1742_s18, 4294967168  ;;  %s27_s14 = sadd.s32 1, %s2368_s14   ;;  %s2866_s12 = sld [smem:[#allocation16_spill]] }
 0x620   : > { %p24_p7 = scmp.ge.s32.totalorder %s27_s14, 4   ;;  %s2867_s13 = sld [smem:[#allocation17_spill]] }
 0x621   : > { %s2868_s30 = smov %s2352_s10  ;;  %s2869_s10 = smov %s2356_s11 }
 0x622   : > { %s2870_s11 = smov %s2565_s22  ;;  %26 = sbr.rel (!%p24_p7) target bundleno = 13 (0xd), region = 118 }
 0x627   :  { %1747 = vsyncpa [#allocation3], 1 }
 0x628   :  { %1749 = vsyncpa [#allocation3 + $0x1], 1 }
 0x629   :  { %1750 = vsyncpa [#allocation6], 1 }
 0x62a   :  { %1751 = vsyncpa [#allocation9], 1 }
 0x62b   :  { %1752 = vsyncpa [#allocation4], 1 }
 0x62c   :  { %1754 = vsyncpa [#allocation4 + $0x1], 1 }

</bundles_post_ra>
